<compile_context>
chip_gen: v7x
topology: tpu7x:2x2x1
jax: 0.10.0
libtpu: 0.0.40
codegen_flags: <defaults>
</compile_context>

<pallas_src>
import functools

import numpy as np
import jax
import jax.numpy as jnp
from jax.experimental import pallas as pl
from jax.experimental.pallas import tpu as pltpu

HIDDEN = 128
LANE = 128


def _round_up(x, m):
    return ((x + m - 1) // m) * m


# ----------------------------------------------------------------------------
# Pallas kernel: full actor forward on one batch tile.
# ----------------------------------------------------------------------------
def actor_kernel(x_ref, w1_ref, b1_ref, w2_ref, b2_ref, wh_ref, bh_ref,
                 lo_ref, hi_ref, out_ref, *, out_width):
    # fc1 + relu  (bf16 MXU inputs, f32 accumulate, f32 elementwise)
    h1 = jnp.dot(x_ref[...], w1_ref[...],
                 preferred_element_type=jnp.float32)                 # [TB, 128]
    h1 = jnp.maximum(h1 + b1_ref[...], 0.0)

    # fc2 + relu
    h2 = jnp.dot(h1.astype(jnp.bfloat16), w2_ref[...],
                 preferred_element_type=jnp.float32)                 # [TB, 128]
    h2 = jnp.maximum(h2 + b2_ref[...], 0.0)

    # fused mean|logstd head: one lane-dense 128-wide matmul.
    head = jnp.dot(h2.astype(jnp.bfloat16), wh_ref[...],
                   preferred_element_type=jnp.float32)
    head = head + bh_ref[...]                                        # [TB, Hp]

    # logstd clamp as two VPU ops against precomputed per-column bound rows
    # (mean / padded columns carry +/-FLT_MAX bounds -> pass-through).
    head = jnp.minimum(jnp.maximum(head, lo_ref[...]), hi_ref[...])

    # narrow store: only the real mean|logstd columns go back to HBM.
    out_ref[...] = head[:, :out_width]


# ----------------------------------------------------------------------------
# One-time parameter packing: fuse heads, build clamp bound rows, cast bf16.
# ----------------------------------------------------------------------------
def pack_actor_params(params):
    def _row(b, n):
        b = jnp.asarray(b, jnp.float32).reshape(1, -1)
        assert b.shape == (1, n), f"bias shape {b.shape} != (1, {n})"
        return b

    w1 = jnp.asarray(params["w1"], jnp.float32)
    w2 = jnp.asarray(params["w2"], jnp.float32)
    wm = jnp.asarray(params["wm"], jnp.float32)
    wl = jnp.asarray(params["wl"], jnp.float32)
    S, H = w1.shape
    A = wm.shape[1]
    assert H == HIDDEN and w2.shape == (HIDDEN, HIDDEN)
    assert wm.shape == (HIDDEN, A) and wl.shape == (HIDDEN, A)
    b1 = _row(params["b1"], HIDDEN)
    b2 = _row(params["b2"], HIDDEN)
    bm = _row(params["bm"], A)
    bl = _row(params["bl"], A)

    Hp = _round_up(max(2 * A, LANE), LANE)       # lane-dense fused head width

    wh = jnp.zeros((HIDDEN, Hp), jnp.float32)
    wh = wh.at[:, :A].set(wm).at[:, A:2 * A].set(wl)
    bh = jnp.zeros((1, Hp), jnp.float32)
    bh = bh.at[:, :A].set(bm).at[:, A:2 * A].set(bl)

    big = float(np.finfo(np.float32).max)
    lo = np.full((1, Hp), -big, np.float32)
    hi = np.full((1, Hp), big, np.float32)
    lo[0, A:2 * A] = -20.0
    hi[0, A:2 * A] = 2.0

    return {
        "w1": w1.astype(jnp.bfloat16),           # (S, 128) -- no lane padding
        "b1": b1,
        "w2": w2.astype(jnp.bfloat16),
        "b2": b2,
        "wh": wh.astype(jnp.bfloat16),
        "bh": bh,
        "lo": jnp.asarray(lo),
        "hi": jnp.asarray(hi),
        "state_dim": S,
        "action_dim": A,
        "head_pad": Hp,
    }


def _choose_tb(batch, tb_max):
    b16 = _round_up(max(batch, 1), 16)           # bf16 tiles need rows % 16
    if b16 <= 32:
        return b16
    # Keep >=2 grid steps so v7x's two TensorCores both get work; otherwise
    # the biggest tile wins (per-step overhead ~0.35us >> per-tile MXU work).
    return max(16, min(tb_max, _round_up(pl.cdiv(b16, 2), 16)))


# ----------------------------------------------------------------------------
# Wrapper: batch-tiled pallas_call; returns (mean, logstd) like the nn.Module.
# ----------------------------------------------------------------------------
def actor_forward(state, pp, *, tb=1024):
    B, S = state.shape
    A, Hp = pp["action_dim"], pp["head_pad"]
    assert S == pp["state_dim"]
    OW = 2 * A                                   # narrow fused output width

    weight_bytes = sum(int(a.size) * a.dtype.itemsize
                       for a in (pp["w1"], pp["b1"], pp["w2"], pp["b2"],
                                 pp["wh"], pp["bh"], pp["lo"], pp["hi"]))

    def vmem_need(t):                            # rough per-step VMEM budget
        return (2 * t * _round_up(S, LANE) * 2       # bf16 state, dbl-buffered
                + 2 * t * _round_up(OW, LANE) * 4    # f32 out, dbl-buffered
                + 5 * t * HIDDEN * 4                 # in-kernel f32 temps
                + weight_bytes)                      # resident weights/bounds

    TB = _choose_tb(B, tb)
    while TB > 16 and vmem_need(TB) > (28 << 20):    # v7x: 64 MiB physical VMEM
        TB = _round_up(TB // 2, 16)
    Bp = _round_up(B, TB)

    # bf16 feed halves the dominant HBM read; only the batch axis gets a
    # (cheap) pad -- no lane padding of the state anymore.
    # TODO(synk): store rollout states bf16 upstream to skip this cast copy.
    x = state.astype(jnp.bfloat16)
    if Bp != B:
        x = jnp.pad(x, ((0, Bp - B), (0, 0)))

    grid = (Bp // TB,)
    flops = 2 * Bp * (S * HIDDEN + HIDDEN * HIDDEN + HIDDEN * Hp)
    bytes_accessed = Bp * S * 2 + weight_bytes + Bp * OW * 4
    vmem_limit = int(min(48 << 20, max(vmem_need(TB) + (4 << 20), 16 << 20)))

    out = pl.pallas_call(
        functools.partial(actor_kernel, out_width=OW),
        out_shape=jax.ShapeDtypeStruct((Bp, OW), jnp.float32),
        grid=grid,
        in_specs=[
            pl.BlockSpec((TB, S), lambda i: (i, 0)),           # state tile
            pl.BlockSpec((S, HIDDEN), lambda i: (0, 0)),       # w1 (resident)
            pl.BlockSpec((1, HIDDEN), lambda i: (0, 0)),       # b1
            pl.BlockSpec((HIDDEN, HIDDEN), lambda i: (0, 0)),  # w2
            pl.BlockSpec((1, HIDDEN), lambda i: (0, 0)),       # b2
            pl.BlockSpec((HIDDEN, Hp), lambda i: (0, 0)),      # fused head W
            pl.BlockSpec((1, Hp), lambda i: (0, 0)),           # fused head b
            pl.BlockSpec((1, Hp), lambda i: (0, 0)),           # clamp lo row
            pl.BlockSpec((1, Hp), lambda i: (0, 0)),           # clamp hi row
        ],
        out_specs=pl.BlockSpec((TB, OW), lambda i: (i, 0)),
        compiler_params=pltpu.CompilerParams(
            dimension_semantics=("parallel",),
            vmem_limit_bytes=vmem_limit),
        cost_estimate=pl.CostEstimate(
            flops=flops, transcendentals=0, bytes_accessed=bytes_accessed),
    )(x, pp["w1"], pp["b1"], pp["w2"], pp["b2"], pp["wh"], pp["bh"],
      pp["lo"], pp["hi"])

    mean = out[:B, :A]
    logstd = out[:B, A:2 * A]
    return mean, logstd


# ----------------------------------------------------------------------------
# Deterministic parameter init (orthogonal, gain sqrt(2), zero biases),
# mirroring ActorNetwork.init_weights.
# ----------------------------------------------------------------------------
def init_actor_params(key, state_dim, action_dim, hidden=HIDDEN):
    ortho = jax.nn.initializers.orthogonal(scale=float(np.sqrt(2.0)))
    k1, k2, k3, k4 = jax.random.split(key, 4)
    return {
        "w1": ortho(k1, (state_dim, hidden), jnp.float32),
        "b1": jnp.zeros((1, hidden), jnp.float32),
        "w2": ortho(k2, (hidden, hidden), jnp.float32),
        "b2": jnp.zeros((1, hidden), jnp.float32),
        "wm": ortho(k3, (hidden, action_dim), jnp.float32),
        "bm": jnp.zeros((1, action_dim), jnp.float32),
        "wl": ortho(k4, (hidden, action_dim), jnp.float32),
        "bl": jnp.zeros((1, action_dim), jnp.float32),
    }


# Pure-JAX reference with the same bf16-matmul / f32-accumulate numerics.
def actor_forward_ref(state, p):
    bf = jnp.bfloat16
    h1 = jnp.maximum(
        jnp.dot(state.astype(bf), p["w1"].astype(bf),
                preferred_element_type=jnp.float32) + p["b1"], 0.0)
    h2 = jnp.maximum(
        jnp.dot(h1.astype(bf), p["w2"].astype(bf),
                preferred_element_type=jnp.float32) + p["b2"], 0.0)
    mean = jnp.dot(h2.astype(bf), p["wm"].astype(bf),
                   preferred_element_type=jnp.float32) + p["bm"]
    logstd = jnp.clip(
        jnp.dot(h2.astype(bf), p["wl"].astype(bf),
                preferred_element_type=jnp.float32) + p["bl"], -20.0, 2.0)
    return mean, logstd


if __name__ == "__main__":
    key = jax.random.PRNGKey(0)
    k_params, k_state = jax.random.split(key)

    batch, state_dim, action_dim = 8, 16, 4
    params = init_actor_params(k_params, state_dim, action_dim)
    packed = pack_actor_params(params)
    state = jax.random.normal(k_state, (batch, state_dim), dtype=jnp.float32)

    mean, logstd = actor_forward(state, packed)
    mean = jax.block_until_ready(mean)
    logstd = jax.block_until_ready(logstd)

    mean_ref, logstd_ref = actor_forward_ref(state, params)
    np.testing.assert_allclose(np.asarray(mean), np.asarray(mean_ref),
                               rtol=1e-2, atol=1e-2)
    np.testing.assert_allclose(np.asarray(logstd), np.asarray(logstd_ref),
                               rtol=1e-2, atol=1e-2)

    print("KERNEL_OK")
</pallas_src>

<mosaic_0001>
module attributes {stable_mosaic.version = 11 : i64} {
  func.func @actor_kernel(%arg0: i32, %arg1: memref<16x16xbf16, #tpu.memory_space<vmem>>, %arg2: memref<16x128xbf16, #tpu.memory_space<vmem>>, %arg3: memref<1x128xf32, #tpu.memory_space<vmem>>, %arg4: memref<128x128xbf16, #tpu.memory_space<vmem>>, %arg5: memref<1x128xf32, #tpu.memory_space<vmem>>, %arg6: memref<128x128xbf16, #tpu.memory_space<vmem>>, %arg7: memref<1x128xf32, #tpu.memory_space<vmem>>, %arg8: memref<1x128xf32, #tpu.memory_space<vmem>>, %arg9: memref<1x128xf32, #tpu.memory_space<vmem>>, %arg10: memref<16x8xf32, #tpu.memory_space<vmem>>) attributes {dimension_semantics = [#tpu.dimension_semantics<parallel>], iteration_bounds = array<i64: 1>, scalar_prefetch = 0 : i64, scratch_operands = 0 : i64, tpu.core_type = #tpu.core_type<tc>, window_params = [{transform_indices = @transform_0, window_bounds = array<i64: 16, 16>}, {pipeline_mode = #tpu.pipeline_mode<synchronous>, transform_indices = @transform_1, window_bounds = array<i64: 16, 128>}, {pipeline_mode = #tpu.pipeline_mode<synchronous>, transform_indices = @transform_2, window_bounds = array<i64: 1, 128>}, {pipeline_mode = #tpu.pipeline_mode<synchronous>, transform_indices = @transform_3, window_bounds = array<i64: 128, 128>}, {pipeline_mode = #tpu.pipeline_mode<synchronous>, transform_indices = @transform_4, window_bounds = array<i64: 1, 128>}, {pipeline_mode = #tpu.pipeline_mode<synchronous>, transform_indices = @transform_5, window_bounds = array<i64: 128, 128>}, {pipeline_mode = #tpu.pipeline_mode<synchronous>, transform_indices = @transform_6, window_bounds = array<i64: 1, 128>}, {pipeline_mode = #tpu.pipeline_mode<synchronous>, transform_indices = @transform_7, window_bounds = array<i64: 1, 128>}, {pipeline_mode = #tpu.pipeline_mode<synchronous>, transform_indices = @transform_8, window_bounds = array<i64: 1, 128>}, {transform_indices = @transform_9, window_bounds = array<i64: 16, 8>}]} {
    %c0 = arith.constant 0 : index
    %c0_0 = arith.constant 0 : index
    %0 = vector.load %arg1[%c0, %c0_0] : memref<16x16xbf16, #tpu.memory_space<vmem>>, vector<16x16xbf16>
    %c0_1 = arith.constant 0 : index
    %c0_2 = arith.constant 0 : index
    %1 = vector.load %arg2[%c0_1, %c0_2] : memref<16x128xbf16, #tpu.memory_space<vmem>>, vector<16x128xbf16>
    %cst = arith.constant dense<0.000000e+00> : vector<16x128xf32>
    %2 = tpu.matmul %0, %1, %cst {dimension_numbers = #tpu.dot_dimension_numbers<[1], [0], [0], [1], [0, 0, 1, 1], [], []>} : vector<16x16xbf16>, vector<16x128xbf16>, vector<16x128xf32> -> vector<16x128xf32>
    %c0_3 = arith.constant 0 : index
    %c0_4 = arith.constant 0 : index
    %3 = vector.load %arg3[%c0_3, %c0_4] : memref<1x128xf32, #tpu.memory_space<vmem>>, vector<1x128xf32>
    %4 = vector.broadcast %3 : vector<1x128xf32> to vector<16x128xf32>
    %5 = arith.addf %2, %4 : vector<16x128xf32>
    %cst_5 = arith.constant 0.000000e+00 : f32
    %6 = vector.broadcast %cst_5 : f32 to vector<16x128xf32>
    %7 = arith.maximumf %5, %6 : vector<16x128xf32>
    %8 = arith.truncf %7 : vector<16x128xf32> to vector<16x128xbf16>
    %c0_6 = arith.constant 0 : index
    %c0_7 = arith.constant 0 : index
    %9 = vector.load %arg4[%c0_6, %c0_7] : memref<128x128xbf16, #tpu.memory_space<vmem>>, vector<128x128xbf16>
    %cst_8 = arith.constant dense<0.000000e+00> : vector<16x128xf32>
    %10 = tpu.matmul %8, %9, %cst_8 {dimension_numbers = #tpu.dot_dimension_numbers<[1], [0], [0], [1], [0, 0, 1, 1], [], []>} : vector<16x128xbf16>, vector<128x128xbf16>, vector<16x128xf32> -> vector<16x128xf32>
    %c0_9 = arith.constant 0 : index
    %c0_10 = arith.constant 0 : index
    %11 = vector.load %arg5[%c0_9, %c0_10] : memref<1x128xf32, #tpu.memory_space<vmem>>, vector<1x128xf32>
    %12 = vector.broadcast %11 : vector<1x128xf32> to vector<16x128xf32>
    %13 = arith.addf %10, %12 : vector<16x128xf32>
    %cst_11 = arith.constant 0.000000e+00 : f32
    %14 = vector.broadcast %cst_11 : f32 to vector<16x128xf32>
    %15 = arith.maximumf %13, %14 : vector<16x128xf32>
    %16 = arith.truncf %15 : vector<16x128xf32> to vector<16x128xbf16>
    %c0_12 = arith.constant 0 : index
    %c0_13 = arith.constant 0 : index
    %17 = vector.load %arg6[%c0_12, %c0_13] : memref<128x128xbf16, #tpu.memory_space<vmem>>, vector<128x128xbf16>
    %cst_14 = arith.constant dense<0.000000e+00> : vector<16x128xf32>
    %18 = tpu.matmul %16, %17, %cst_14 {dimension_numbers = #tpu.dot_dimension_numbers<[1], [0], [0], [1], [0, 0, 1, 1], [], []>} : vector<16x128xbf16>, vector<128x128xbf16>, vector<16x128xf32> -> vector<16x128xf32>
    %c0_15 = arith.constant 0 : index
    %c0_16 = arith.constant 0 : index
    %19 = vector.load %arg7[%c0_15, %c0_16] : memref<1x128xf32, #tpu.memory_space<vmem>>, vector<1x128xf32>
    %20 = vector.broadcast %19 : vector<1x128xf32> to vector<16x128xf32>
    %21 = arith.addf %18, %20 : vector<16x128xf32>
    %c0_17 = arith.constant 0 : index
    %c0_18 = arith.constant 0 : index
    %22 = vector.load %arg8[%c0_17, %c0_18] : memref<1x128xf32, #tpu.memory_space<vmem>>, vector<1x128xf32>
    %23 = vector.broadcast %22 : vector<1x128xf32> to vector<16x128xf32>
    %24 = arith.maximumf %21, %23 : vector<16x128xf32>
    %c0_19 = arith.constant 0 : index
    %c0_20 = arith.constant 0 : index
    %25 = vector.load %arg9[%c0_19, %c0_20] : memref<1x128xf32, #tpu.memory_space<vmem>>, vector<1x128xf32>
    %26 = vector.broadcast %25 : vector<1x128xf32> to vector<16x128xf32>
    %27 = arith.minimumf %24, %26 : vector<16x128xf32>
    %28 = vector.extract_strided_slice %27 {offsets = [0, 0], sizes = [16, 8], strides = [1, 1]} : vector<16x128xf32> to vector<16x8xf32>
    %c0_21 = arith.constant 0 : index
    %c0_22 = arith.constant 0 : index
    %29 = vector.load %arg10[%c0_21, %c0_22] : memref<16x8xf32, #tpu.memory_space<vmem>>, vector<16x8xf32>
    tpu.vector_store %arg10[%c0_21, %c0_22], %28 {strides = array<i32>} : memref<16x8xf32, #tpu.memory_space<vmem>>, vector<16x8xf32>,
    return
  }
  func.func @transform_0(%arg0: i32) -> (i32, i32) {
    %c0_i32 = arith.constant 0 : i32
    %c0_i32_0 = arith.constant 0 : i32
    return %arg0, %c0_i32 : i32, i32
  }
  func.func @transform_1(%arg0: i32) -> (i32, i32) {
    %c0_i32 = arith.constant 0 : i32
    %c0_i32_0 = arith.constant 0 : i32
    %c0_i32_1 = arith.constant 0 : i32
    return %c0_i32, %c0_i32_0 : i32, i32
  }
  func.func @transform_2(%arg0: i32) -> (i32, i32) {
    %c0_i32 = arith.constant 0 : i32
    %c0_i32_0 = arith.constant 0 : i32
    %c0_i32_1 = arith.constant 0 : i32
    return %c0_i32, %c0_i32_0 : i32, i32
  }
  func.func @transform_3(%arg0: i32) -> (i32, i32) {
    %c0_i32 = arith.constant 0 : i32
    %c0_i32_0 = arith.constant 0 : i32
    %c0_i32_1 = arith.constant 0 : i32
    return %c0_i32, %c0_i32_0 : i32, i32
  }
  func.func @transform_4(%arg0: i32) -> (i32, i32) {
    %c0_i32 = arith.constant 0 : i32
    %c0_i32_0 = arith.constant 0 : i32
    %c0_i32_1 = arith.constant 0 : i32
    return %c0_i32, %c0_i32_0 : i32, i32
  }
  func.func @transform_5(%arg0: i32) -> (i32, i32) {
    %c0_i32 = arith.constant 0 : i32
    %c0_i32_0 = arith.constant 0 : i32
    %c0_i32_1 = arith.constant 0 : i32
    return %c0_i32, %c0_i32_0 : i32, i32
  }
  func.func @transform_6(%arg0: i32) -> (i32, i32) {
    %c0_i32 = arith.constant 0 : i32
    %c0_i32_0 = arith.constant 0 : i32
    %c0_i32_1 = arith.constant 0 : i32
    return %c0_i32, %c0_i32_0 : i32, i32
  }
  func.func @transform_7(%arg0: i32) -> (i32, i32) {
    %c0_i32 = arith.constant 0 : i32
    %c0_i32_0 = arith.constant 0 : i32
    %c0_i32_1 = arith.constant 0 : i32
    return %c0_i32, %c0_i32_0 : i32, i32
  }
  func.func @transform_8(%arg0: i32) -> (i32, i32) {
    %c0_i32 = arith.constant 0 : i32
    %c0_i32_0 = arith.constant 0 : i32
    %c0_i32_1 = arith.constant 0 : i32
    return %c0_i32, %c0_i32_0 : i32, i32
  }
  func.func @transform_9(%arg0: i32) -> (i32, i32) {
    %c0_i32 = arith.constant 0 : i32
    %c0_i32_0 = arith.constant 0 : i32
    return %arg0, %c0_i32 : i32, i32
  }
}

</mosaic_0001>

<bundles_post_ra>
// kernel: tpu_custom_call.1
= control target key start
LH: loop header
LB: loop body
LE: loop exit
PB: predicated region body
PF: predicated region fallthrough
CT: control target
= control target key end

     0   :  { %14 = vsyncpa [#allocation3], 0  ;;  %s796_s0 = inlined_call_operand.hbm [shape: bf16[16,16], index: 0, kind: input, shape index: {}]   ;;  %s797_s1 = inlined_call_operand.hbm [shape: bf16[16,128], index: 1, kind: input, shape index: {}]   ;;  %s798_s2 = inlined_call_operand.vmem [shape: f32[1,128], index: 2, kind: input, shape index: {}]   ;;  %s799_s3 = inlined_call_operand.hbm [shape: bf16[128,128], index: 3, kind: input, shape index: {}]   ;;  %s800_s4 = inlined_call_operand.vmem [shape: f32[1,128], index: 4, kind: input, shape index: {}]   ;;  %s801_s5 = inlined_call_operand.hbm [shape: bf16[128,128], index: 5, kind: input, shape index: {}]   ;;  %s802_s6 = inlined_call_operand.vmem [shape: f32[1,128], index: 6, kind: input, shape index: {}]   ;;  %s803_s7 = inlined_call_operand.vmem [shape: f32[1,128], index: 7, kind: input, shape index: {}]   ;;  %s804_s8 = inlined_call_operand.vmem [shape: f32[1,128], index: 8, kind: input, shape index: {}]   ;;  %s805_s9 = inlined_call_operand.vmem [shape: f32[16,8], index: 9, kind: output, shape index: {}]  }
   0x1   :  { %15 = vsyncpa [#allocation5], 0 }
   0x2   :  { %16 = vsyncpa [#allocation8], 0  ;;  %s623_s30 = smov [#allocation4]   ;;  %s624_s11 = smov [#allocation2]  }
   0x3   :  { %s34_s10 = sshll.u32 %s623_s30, 4  ;;  %s22_s12 = sshll.u32 %s624_s11, 4  ;;  %s35_s10 = int_to_ptr.vmem [resolvable:$true] %s34_s10  ;;  %s681_s12 = int_to_ptr.vmem [resolvable:$true] %s22_s12 }
   0x4   :  { %s529_s15 = scalar_lea.hbm %s797_s1, 128 }
   0x5   :  { %p530_p0 = scmp.ne.s32.totalorder %s797_s1, %s529_s15  ;;  %p533_p1 = scmp.lt.u32.totalorder %s529_s15, %s797_s1 }
   0x7   :  { %p535_p2 = pnand %p533_p1, %p530_p0 }
   0x9   :  { %538 = shalt.err (!%p535_p2)
}
   0xa   :  { %s539_s20 = scalar_lea.vmem %s35_s10, 128  ;;  %p544_p4 = scmp.lt.s32.totalorder %s35_s10, %s35_s10 }
   0xb   :  { %p540_p3 = scmp.ne.s32.totalorder %s35_s10, %s539_s20  ;;  %p545_p5 = scmp.lt.s32.totalorder %s539_s20, %s539_s20 }
   0xd   :  { %p546_p6 = por %p545_p5, %p544_p4 }
   0xf   :  { %p547_p7 = pnand %p546_p6, %p540_p3 }
  0x11   :  { %550 = shalt.err (!%p547_p7)
}
  0x12   :  { %s625_s21 = smov 64   ;;  %s626_s22 = smov 4  }
  0x13   :  { %40 = dma.hbm_to_vmem [thread:$0]  %s797_s1, 128, %s35_s10, [#allocation5], %s625_s21, %s625_s21, %s626_s22  }
  0x14   :  { %s551_s27 = scalar_lea.hbm %s796_s0, 128 }
  0x15   :  { %p552_p8 = scmp.ne.s32.totalorder %s796_s0, %s551_s27  ;;  %p555_p9 = scmp.lt.u32.totalorder %s551_s27, %s796_s0 }
  0x17   :  { %p557_p10 = pnand %p555_p9, %p552_p8 }
  0x19   :  { %560 = shalt.err (!%p557_p10)
}
  0x1a   :  { %s561_s13 = scalar_lea.vmem %s681_s12, 128  ;;  %p566_p12 = scmp.lt.s32.totalorder %s681_s12, %s681_s12 }
  0x1b   :  { %p562_p11 = scmp.ne.s32.totalorder %s681_s12, %s561_s13  ;;  %p567_p13 = scmp.lt.s32.totalorder %s561_s13, %s561_s13 }
  0x1d   :  { %p568_p0 = por %p567_p13, %p566_p12 }
  0x1f   :  { %p569_p1 = pnand %p568_p0, %p562_p11 }
  0x21   :  { %572 = shalt.err (!%p569_p1)
}
  0x22   :  { %28 = dma.hbm_to_vmem [thread:$0]  %s796_s0, 128, %s681_s12, [#allocation3], %s625_s21, %s625_s21, %s626_s22  }
  0x23   :  { %s627_s14 = smov [#allocation6]   ;;  %s628_s16 = smov [#allocation7]  }
  0x24   :  { %s48_s15 = sshll.u32 %s627_s14, 4  ;;  %s62_s17 = sshll.u32 %s628_s16, 4  ;;  %s49_s15 = int_to_ptr.vmem [resolvable:$true] %s48_s15  ;;  %s718_s17 = int_to_ptr.vmem [resolvable:$true] %s62_s17 }
  0x25   :  { %s573_s20 = scalar_lea.hbm %s799_s3, 1024 }
  0x26   :  { %p574_p2 = scmp.ne.s32.totalorder %s799_s3, %s573_s20  ;;  %p577_p3 = scmp.lt.u32.totalorder %s573_s20, %s799_s3 }
  0x28   :  { %p579_p4 = pnand %p577_p3, %p574_p2 }
  0x2a   :  { %582 = shalt.err (!%p579_p4)
}
  0x2b   :  { %s583_s0 = scalar_lea.vmem %s49_s15, 1024  ;;  %p588_p6 = scmp.lt.s32.totalorder %s49_s15, %s49_s15 }
  0x2c   :  { %p584_p5 = scmp.ne.s32.totalorder %s49_s15, %s583_s0  ;;  %p589_p7 = scmp.lt.s32.totalorder %s583_s0, %s583_s0 }
  0x2e   :  { %p590_p8 = por %p589_p7, %p588_p6 }
  0x30   :  { %p591_p9 = pnand %p590_p8, %p584_p5 }
  0x32   :  { %594 = shalt.err (!%p591_p9)
}
  0x33   :  { %54 = dma.hbm_to_vmem [thread:$0]  %s799_s3, 1024, %s49_s15, [#allocation5], %s625_s21, %s625_s21, %s626_s22  }
  0x34   :  { %s595_s30 = scalar_lea.hbm %s801_s5, 1024 }
  0x35   :  { %p596_p10 = scmp.ne.s32.totalorder %s801_s5, %s595_s30  ;;  %p599_p11 = scmp.lt.u32.totalorder %s595_s30, %s801_s5 }
  0x37   :  { %p601_p12 = pnand %p599_p11, %p596_p10 }
  0x39   :  { %604 = shalt.err (!%p601_p12)
}
  0x3a   :  { %s605_s14 = scalar_lea.vmem %s718_s17, 1024  ;;  %p610_p0 = scmp.lt.s32.totalorder %s718_s17, %s718_s17 }
  0x3b   :  { %p606_p13 = scmp.ne.s32.totalorder %s718_s17, %s605_s14  ;;  %p611_p1 = scmp.lt.s32.totalorder %s605_s14, %s605_s14 }
  0x3d   :  { %p612_p2 = por %p611_p1, %p610_p0 }
  0x3f   :  { %p613_p3 = pnand %p612_p2, %p606_p13 }
  0x41   :  { %616 = shalt.err (!%p613_p3)
}
  0x42   :  { %68 = dma.hbm_to_vmem [thread:$0]  %s801_s5, 1024, %s718_s17, [#allocation8], %s625_s21, %s625_s21, %s626_s22  }
  0x43   :  { %617 = dma.done.wait [#allocation3], 128  }
  0x44   :  { %618 = vsyncadd [#allocation3], 4294967168 }
  0x45   :  { %619 = dma.done.wait [#allocation5], 1152  }
  0x46   :  { %620 = vsyncadd [#allocation5], 4294966144 }
  0x47   :  { %621 = dma.done.wait [#allocation8], 1024  }
  0x48   :  { %622 = vsyncadd [#allocation8], 4294966272  ;;  %v629_v0 = vmov 0.0   ;;  %vm630_vm0 = vmmov 0   ;;  %v511_v1 = vld [vmem:[#allocation4] sm:$0xff]   ;;  %v512_v2 = vld [vmem:[#allocation2] sm:$0xff]  }
  0x49   :  { %457 = vmatprep.subr.bf16.mxu0 %v629_v0  ;;  %459 = vmatprep.mubr.msk.bf16.mxu0 %vm630_vm0, %v629_v0  ;;  %vm110_vm1 = vcmask 130048   ;;  %v513_v3 = vld [vmem:[#allocation6] sm:$0xff]   ;;  %v514_v4 = vld [vmem:[#allocation6 + $0x8] sm:$0xff]   ;;  %v515_v5 = vld [vmem:[#allocation6 + $0x10] sm:$0xff]   ;;  %vm403_vm2 = vcmask 64512  }
  0x4a   :  { %463 = vmatprep.subr.bf16.mxu1 %v629_v0  ;;  %479 = vmatprep.mubr.msk.bf16.mxu1 %vm630_vm0, %v629_v0  ;;  %v516_v6 = vld [vmem:[#allocation6 + $0x18] sm:$0xff]   ;;  %v517_v7 = vld [vmem:[#allocation6 + $0x20] sm:$0xff]   ;;  %v518_v8 = vld [vmem:[#allocation6 + $0x28] sm:$0xff]  }
  0x4b   :  { %458 = vmatpush3.bf16.msra.mxu0 %v511_v1  ;;  %464 = vmatpush3.bf16.msra.mxu1 %v513_v3  ;;  %v519_v9 = vld [vmem:[#allocation6 + $0x30] sm:$0xff]   ;;  %v520_v10 = vld [vmem:[#allocation6 + $0x38] sm:$0xff]   ;;  %v521_v11 = vld [vmem:[#allocation7] sm:$0xff]  }
  0x4c   :  { %483 = vmatprep.subr.bf16.mxu0 %v629_v0  ;;  %465 = vmatprep.subr.bf16.mxu1 %v629_v0  ;;  %v522_v12 = vld [vmem:[#allocation7 + $0x8] sm:$0xff]   ;;  %v523_v13 = vld [vmem:[#allocation7 + $0x10] sm:$0xff]   ;;  %v524_v14 = vld [vmem:[#allocation7 + $0x18] sm:$0xff]  }
  0x4d   :  { %v525_v15 = vld [vmem:[#allocation7 + $0x20] sm:$0xff]   ;;  %v526_v16 = vld [vmem:[#allocation7 + $0x28] sm:$0xff]   ;;  %v527_v27 = vld [vmem:[#allocation7 + $0x30] sm:$0xff]  }
  0x4e   :  { %460 = vmatmul.mubr.msk.bf16.vlgmr.msra.gmra.mrb[0].mxu0 %vm110_vm1, %v512_v2  ;;  %v413_v17 = vld [vmem:[%s798_s2] ss:$0 sm:$0xff]  ;;  %v528_v28 = vld [vmem:[#allocation7 + $0x38] sm:$0xff]  }
  0x4f   :  { %499 = vmatprep.mubr.msk.bf16.mxu0 %vm630_vm0, %v629_v0  ;;  %466 = vmatpush3.bf16.msra.mxu1 %v514_v4  ;;  %v417_v29 = vld [vmem:[%s800_s4] ss:$0 sm:$0xff] }
  0x50   :  { %467 = vmatprep.subr.bf16.mxu1 %v629_v0  ;;  %484 = vmatpush3.bf16.msra.mxu0 %v521_v11  ;;  %v426_v39 = vld [vmem:[%s802_s6] ss:$0 sm:$0xff] }
  0x51   :  { %485 = vmatprep.subr.bf16.mxu0 %v629_v0  ;;  %v435_v41 = vld [vmem:[%s803_s7] ss:$0 sm:$0xff] }
  0x52   :  { %v436_v44 = vld [vmem:[%s804_s8] ss:$0 sm:$0xff] }
  0x53   :  { %468 = vmatpush3.bf16.msra.mxu1 %v515_v5 }
  0x54   :  { %469 = vmatprep.subr.bf16.mxu1 %v629_v0  ;;  %486 = vmatpush3.bf16.msra.mxu0 %v522_v12 }
  0x55   :  { %487 = vmatprep.subr.bf16.mxu0 %v629_v0 }
  0x57   :  { %470 = vmatpush3.bf16.msra.mxu1 %v516_v6 }
  0x58   :  { %471 = vmatprep.subr.bf16.mxu1 %v629_v0  ;;  %488 = vmatpush3.bf16.msra.mxu0 %v523_v13 }
  0x59   :  { %489 = vmatprep.subr.bf16.mxu0 %v629_v0 }
  0x5b   :  { %472 = vmatpush3.bf16.msra.mxu1 %v517_v7 }
  0x5c   :  { %473 = vmatprep.subr.bf16.mxu1 %v629_v0  ;;  %490 = vmatpush3.bf16.msra.mxu0 %v524_v14 }
  0x5d   :  { %491 = vmatprep.subr.bf16.mxu0 %v629_v0 }
  0x5f   :  { %474 = vmatpush3.bf16.msra.mxu1 %v518_v8 }
  0x60   :  { %475 = vmatprep.subr.bf16.mxu1 %v629_v0  ;;  %492 = vmatpush3.bf16.msra.mxu0 %v525_v15 }
  0x61   :  { %493 = vmatprep.subr.bf16.mxu0 %v629_v0 }
  0x63   :  { %476 = vmatpush3.bf16.msra.mxu1 %v519_v9 }
  0x64   :  { %477 = vmatprep.subr.bf16.mxu1 %v629_v0  ;;  %494 = vmatpush3.bf16.msra.mxu0 %v526_v16 }
  0x65   :  { %495 = vmatprep.subr.bf16.mxu0 %v629_v0 }
  0x67   :  { %478 = vmatpush3.bf16.msra.mxu1 %v520_v10 }
  0x68   :  { %496 = vmatpush3.bf16.msra.mxu0 %v527_v27 }
  0x69   :  { %497 = vmatprep.subr.bf16.mxu0 %v629_v0 }
  0x6c   :  { %498 = vmatpush3.bf16.msra.mxu0 %v528_v28 }
 0x121   :  { %v148_v18 = vpop.f32.mrb[0].mxu0 }
 0x122   :  { %v149_v19 = vadd.f32 %v413_v17, %v148_v18  ;;  %v461_v20 = vpop.f32.mrb[1].mxu0 }
 0x123   :  { %v151_v21 = vpop.f32.mrb[2].mxu0 }
 0x124   :  { %v152_v22 = vadd.f32 %v413_v17, %v151_v21  ;;  %v462_v23 = vpop.f32.mrb[3].mxu0  ;;  %v155_v24 = vmax.f32 %v149_v19, 0.0 }
 0x126   :  { %v156_v25 = vmax.f32 %v152_v22, 0.0 }
 0x128   :  { %v157_v26 = vpack.c.bf16 %v156_v25, %v155_v24 }
 0x12a   :  { %480 = vmatmul.mubr.bf16.vlgmr.msra.gmra.mrb[0].mxu1 %v157_v26 }
 0x1fd   :  { %v263_v30 = vpop.f32.mrb[0].mxu1 }
 0x1fe   :  { %v264_v31 = vadd.f32 %v417_v29, %v263_v30  ;;  %v481_v32 = vpop.f32.mrb[1].mxu1 }
 0x1ff   :  { %v266_v33 = vpop.f32.mrb[2].mxu1 }
 0x200   :  { %v267_v34 = vadd.f32 %v417_v29, %v266_v33  ;;  %v482_v35 = vpop.f32.mrb[3].mxu1  ;;  %v270_v36 = vmax.f32 %v264_v31, 0.0 }
 0x202   :  { %v271_v37 = vmax.f32 %v267_v34, 0.0 }
 0x204   :  { %v272_v38 = vpack.c.bf16 %v271_v37, %v270_v36 }
 0x206   :  { %500 = vmatmul.mubr.bf16.vlgmr.msra.gmra.mrb[4].mxu0 %v272_v38 }
 0x2d9   :  { %v378_v40 = vpop.f32.mrb[4].mxu0 }
 0x2da   :  { %v379_v42 = vadd.f32 %v426_v39, %v378_v40  ;;  %v501_v43 = vpop.f32.mrb[5].mxu0 }
 0x2db   :  { %v381_v45 = vpop.f32.mrb[6].mxu0 }
 0x2dc   :  { %v392_v46 = vmax.f32 %v379_v42, %v435_v41  ;;  %v382_v47 = vadd.f32 %v426_v39, %v381_v45  ;;  %v502_v48 = vpop.f32.mrb[7].mxu0 }
 0x2de   :  { %v401_v49 = vmin.f32 %v392_v46, %v436_v44  ;;  %v393_v50 = vmax.f32 %v382_v47, %v435_v41 }
 0x2e0   :  { %404 = vst.msk [vmem:[%s805_s9] sm:$0xff] %vm403_vm2, %v401_v49  ;;  %v402_v51 = vmin.f32 %v393_v50, %v436_v44 }
 0x2e2   :  { %405 = vst.msk [vmem:[%s805_s9 + $0x8] sm:$0xff] %vm403_vm2, %v402_v51 }
 0x2e3   :  { %410 = vsyncpa [#allocation3], 1 }
 0x2e4   :  { %411 = vsyncpa [#allocation5], 1 }
 0x2e5   :  { %412 = vsyncpa [#allocation8], 1 }

</bundles_post_ra>
